<compile_context>
chip_gen: v7x
topology: tpu7x:2x2x1
jax: 0.10.0
libtpu: 0.0.40
codegen_flags: <defaults>
</compile_context>

<pallas_src>
import jax
import jax.numpy as jnp
from jax import lax
from jax.experimental import pallas as pl
from jax.experimental.pallas import tpu as pltpu

# ----- model hyper-parameters (match the PyTorch __init__ defaults) ---------
VOCAB_SIZE = 50
EMB_DIM = 16
TEXT_DIM = 4
OTHER_FEAT_DIM = 8
OUT_D = 10
IN_DIM = TEXT_DIM + OTHER_FEAT_DIM      # 12 real input columns

H1 = 128        # fc1 hidden
F1 = 64         # fc1 output (folded away)
H2 = 256        # fc2 hidden

LANE = 128      # lane-dense padding target
HALF_OFF = 64   # each token id occupies a 64-lane sub-block of its 128-lane half


def _round_up(x, m):
    return (x + m - 1) // m * m


# ---------------------------------------------------------------------------
# Kernel: one sequence tile of the whole (folded) MLP stack.  5 MXU matmuls.
# ---------------------------------------------------------------------------
def net_kernel(x_ref,
               w1_ref, w23_ref, b23_ref, ea_ref, eb_ref,
               w4_ref, b4_ref, w5_ref, b5_ref,
               out_ref):
    slab = x_ref[...]                    # [TM, 128] f32: cols 0..3 shifted ids,
                                         # 4..11 features, 12 == 1.0 (b1 fold)
    tm = slab.shape[0]
    cdt = w1_ref.dtype                   # compute dtype (bf16 or f32)

    # fc1 Linear(8,128) + ReLU; b1 is folded into w1_pad row 12 (constant lane).
    h1 = jnp.dot(slab.astype(cdt), w1_ref[...],
                 preferred_element_type=jnp.float32)
    h1 = jnp.maximum(h1, 0.0)

    # Embedding lookup as two 128-lane one-hot MXU matmuls (tokens {0,1}/{2,3}).
    # Ids were pre-shifted by 64*(t%2) in the wrapper.  NOTE: an id outside
    # [0, VOCAB_SIZE) silently contributes zeros (PyTorch's nn.Embedding raises).
    col = lax.broadcasted_iota(jnp.int32, (tm, LANE), 1)
    i0 = slab[:, 0:1].astype(jnp.int32)          # trunc == .long() for ids >= 0
    i1 = slab[:, 1:2].astype(jnp.int32)
    i2 = slab[:, 2:3].astype(jnp.int32)
    i3 = slab[:, 3:4].astype(jnp.int32)
    oh_a = ((col == i0).astype(jnp.float32)
            + (col == i1).astype(jnp.float32)).astype(cdt)
    oh_b = ((col == i2).astype(jnp.float32)
            + (col == i3).astype(jnp.float32)).astype(cdt)

    # fc2 first Linear with fc1's second Linear folded in (w23 = w2 @ w3[:64]),
    # plus the embedding half of the concat via the one-hot matmuls.
    h2 = (jnp.dot(h1.astype(cdt), w23_ref[...], preferred_element_type=jnp.float32)
          + jnp.dot(oh_a, ea_ref[...], preferred_element_type=jnp.float32)
          + jnp.dot(oh_b, eb_ref[...], preferred_element_type=jnp.float32)
          + b23_ref[...])
    h2 = jnp.maximum(h2, 0.0)

    h3 = jnp.dot(h2.astype(cdt), w4_ref[...],
                 preferred_element_type=jnp.float32) + b4_ref[...]
    h3 = jnp.maximum(h3, 0.0)

    out_ref[...] = (jnp.dot(h3.astype(cdt), w5_ref[...],
                            preferred_element_type=jnp.float32)
                    + b5_ref[...]).astype(out_ref.dtype)


# ---------------------------------------------------------------------------
# Parameter handling
# ---------------------------------------------------------------------------
def init_params(key):
    """Deterministic parameter init (PyTorch-style uniform fan-in scaling)."""
    def linear(k, fan_in, fan_out):
        k1, k2 = jax.random.split(k)
        bound = 1.0 / jnp.sqrt(fan_in)
        w = jax.random.uniform(k1, (fan_in, fan_out), jnp.float32, -bound, bound)
        b = jax.random.uniform(k2, (1, fan_out), jnp.float32, -bound, bound)
        return w, b

    keys = jax.random.split(key, 6)
    emb_table = jax.random.normal(keys[0], (VOCAB_SIZE, EMB_DIM), jnp.float32)
    w1, b1 = linear(keys[1], OTHER_FEAT_DIM, H1)
    w2, b2 = linear(keys[2], H1, F1)
    w3, b3 = linear(keys[3], F1 + EMB_DIM * TEXT_DIM, H2)      # concat dim = 128
    w4, b4 = linear(keys[4], H2, H2)
    w5, b5 = linear(keys[5], H2, OUT_D)
    return dict(emb_table=emb_table, w1=w1, b1=b1, w2=w2, b2=b2,
                w3=w3, b3=b3, w4=w4, b4=b4, w5=w5, b5=b5)


def fold_params(params, compute_dtype=jnp.bfloat16):
    """One-time transform of raw parameters into lane-dense kernel weights.

    compute_dtype = dtype of the matmul operands (bf16 for v6e/v7x MXU peak,
    f32 for exact math / v5e).  Biases stay f32 (added to f32 accumulators).
    """
    hi = jax.lax.Precision.HIGHEST
    w1, b1 = params["w1"], params["b1"]
    w2, b2 = params["w2"], params["b2"]
    w3, b3 = params["w3"], params["b3"]
    w4, b4 = params["w4"], params["b4"]
    w5, b5 = params["w5"], params["b5"]
    emb = params["emb_table"]

    # fc1 layer 1 consumes the full 128-lane slab: rows 4..11 = w1, row 12 = b1
    # (the slab's constant-1 lane), everything else (id / pad lanes) is zero.
    w1_pad = (jnp.zeros((LANE, H1), jnp.float32)
              .at[TEXT_DIM:IN_DIM, :].set(w1)
              .at[IN_DIM, :].set(b1[0]))

    # fc1 layer 2 folded into fc2 layer 1 (no ReLU between them).
    w3a = w3[:F1, :]
    w23 = jnp.dot(w2, w3a, precision=hi)                        # [128, 256]
    b23 = jnp.dot(b2, w3a, precision=hi) + b3                   # [1, 256]

    # Embedding + concat half of fc2 layer 1:
    #   emb @ w3[64:, :] == onehot @ (blockdiag(emb_table) @ w3[64:, :]),
    # re-laid so each token occupies a 64-lane sub-block of one of two halves.
    w3b = w3[F1:, :]                                            # [64, 256]

    def tok(t):
        return jnp.dot(emb, w3b[t * EMB_DIM:(t + 1) * EMB_DIM, :], precision=hi)

    ea = (jnp.zeros((LANE, H2), jnp.float32)
          .at[:VOCAB_SIZE, :].set(tok(0))
          .at[HALF_OFF:HALF_OFF + VOCAB_SIZE, :].set(tok(1)))
    eb = (jnp.zeros((LANE, H2), jnp.float32)
          .at[:VOCAB_SIZE, :].set(tok(2))
          .at[HALF_OFF:HALF_OFF + VOCAB_SIZE, :].set(tok(3)))

    # Final layer: pad output 10 -> 128 lanes so stores are unmasked/lane-dense.
    w5_pad = jnp.zeros((H2, LANE), jnp.float32).at[:, :OUT_D].set(w5)
    b5_pad = jnp.zeros((1, LANE), jnp.float32).at[:, :OUT_D].set(b5)

    cd = compute_dtype
    return dict(w1=w1_pad.astype(cd),
                w23=w23.astype(cd), b23=b23,
                ea=ea.astype(cd), eb=eb.astype(cd),
                w4=w4.astype(cd), b4=b4,
                w5=w5_pad.astype(cd), b5=b5_pad)


# ---------------------------------------------------------------------------
# Wrapper
# ---------------------------------------------------------------------------
def _choose_tile(seq_len, max_tile=1024):
    """128-multiple row tiles; big tiles for big inputs, but keep >= 4 grid
    steps (2 per v7x TensorCore) so the input/output pipeline can overlap."""
    if seq_len <= 2 * LANE:
        return _round_up(seq_len, 8)            # single small tile
    tile = max_tile
    while tile > LANE and _round_up(seq_len, tile) // tile < 4:
        tile //= 2
    return tile


def net_forward(sentences, folded, *, max_tile=1024):
    """sentences: [seq_len, 12] float32 (ids in cols 0..3) -> [seq_len, OUT_D]."""
    seq_len = sentences.shape[0]
    tile = _choose_tile(seq_len, max_tile)
    padded = _round_up(seq_len, tile)

    sent = sentences.astype(jnp.float32)
    id_shift = jnp.array([0.0, HALF_OFF, 0.0, HALF_OFF], jnp.float32)

    # Lane-dense input slab [padded, 128].  Padded rows stay all-zero: their
    # one-hot hits lane 0 and their bias lane is 0, so they produce garbage
    # rows that the final [:seq_len] slice drops — nothing may reduce over them.
    slab = jnp.zeros((padded, LANE), jnp.float32)
    slab = slab.at[:seq_len, :TEXT_DIM].set(sent[:, :TEXT_DIM] + id_shift)
    slab = slab.at[:seq_len, TEXT_DIM:IN_DIM].set(sent[:, TEXT_DIM:])
    slab = slab.at[:seq_len, IN_DIM].set(1.0)     # constant lane for folded b1
    # TODO(synk): for very large seq_len, pass `sentences` with a (tile, 12)
    # BlockSpec and build the slab in-kernel to avoid this extra HBM pad pass.

    grid = (padded // tile,)
    data_spec = pl.BlockSpec((tile, LANE), lambda i: (i, 0))
    res = lambda shape: pl.BlockSpec(shape, lambda i: (0, 0))

    out = pl.pallas_call(
        net_kernel,
        out_shape=jax.ShapeDtypeStruct((padded, LANE), jnp.float32),
        grid_spec=pltpu.PrefetchScalarGridSpec(
            num_scalar_prefetch=0,
            grid=grid,
            in_specs=[
                data_spec,                                # input slab
                res((LANE, H1)),                          # w1_pad (b1 folded in)
                res((H1, H2)), res((1, H2)),              # w23, b23 (= b2@w3a + b3)
                res((LANE, H2)), res((LANE, H2)),         # embw3 halves (ea, eb)
                res((H2, H2)), res((1, H2)),              # w4, b4
                res((H2, LANE)), res((1, LANE)),          # w5_pad, b5_pad
            ],
            out_specs=pl.BlockSpec((tile, LANE), lambda i: (i, 0)),
        ),
        compiler_params=pltpu.CompilerParams(dimension_semantics=("parallel",)),
    )(slab,
      folded["w1"], folded["w23"], folded["b23"], folded["ea"], folded["eb"],
      folded["w4"], folded["b4"], folded["w5"], folded["b5"])

    return out[:seq_len, :OUT_D]


def net_forward_ref(sentences, params):
    """Pure-JAX reference (mirrors the PyTorch forward) for correctness checks."""
    with jax.default_matmul_precision("highest"):
        seq_len = sentences.shape[0]
        text_ids = sentences[:, :TEXT_DIM].astype(jnp.int32)
        other = sentences[:, TEXT_DIM:]
        emb = jnp.take(params["emb_table"], text_ids, axis=0).reshape(seq_len, -1)
        f1 = (jnp.maximum(other @ params["w1"] + params["b1"], 0.0)
              @ params["w2"] + params["b2"])
        x = jnp.concatenate([f1, emb], axis=1)
        h = jnp.maximum(x @ params["w3"] + params["b3"], 0.0)
        h = jnp.maximum(h @ params["w4"] + params["b4"], 0.0)
        return h @ params["w5"] + params["b5"]


if __name__ == "__main__":
    key = jax.random.PRNGKey(0)
    k_param, k_text, k_feat, k_text2, k_feat2 = jax.random.split(key, 5)

    params = init_params(k_param)
    folded_f32 = fold_params(params, compute_dtype=jnp.float32)    # exact-math path
    folded_bf16 = fold_params(params, compute_dtype=jnp.bfloat16)  # MXU-fast path

    # --- small case (seq_len = 8), the module's nominal per-call shape -------
    seq_len = 8
    text_cols = jax.random.randint(k_text, (seq_len, TEXT_DIM), 0, VOCAB_SIZE).astype(jnp.float32)
    feat_cols = jax.random.normal(k_feat, (seq_len, OTHER_FEAT_DIM), jnp.float32)
    sentences = jnp.concatenate([text_cols, feat_cols], axis=1)    # [8, 12]
    ref = net_forward_ref(sentences, params)

    out = jax.block_until_ready(net_forward(sentences, folded_f32))
    assert out.shape == (seq_len, OUT_D)
    assert jnp.allclose(out, ref, atol=2e-3, rtol=2e-3)

    out_bf = jax.block_until_ready(net_forward(sentences, folded_bf16))
    assert out_bf.shape == (seq_len, OUT_D)
    assert jnp.allclose(out_bf, ref, atol=5e-2, rtol=5e-2)

    # --- larger, non-multiple seq_len exercises the row tiling + padding -----
    seq_len2 = 300
    text2 = jax.random.randint(k_text2, (seq_len2, TEXT_DIM), 0, VOCAB_SIZE).astype(jnp.float32)
    feat2 = jax.random.normal(k_feat2, (seq_len2, OTHER_FEAT_DIM), jnp.float32)
    sent2 = jnp.concatenate([text2, feat2], axis=1)                # [300, 12]
    ref2 = net_forward_ref(sent2, params)

    out2 = jax.block_until_ready(net_forward(sent2, folded_f32))
    assert out2.shape == (seq_len2, OUT_D)
    assert jnp.allclose(out2, ref2, atol=2e-3, rtol=2e-3)

    out2_bf = jax.block_until_ready(net_forward(sent2, folded_bf16))
    assert out2_bf.shape == (seq_len2, OUT_D)
    assert jnp.allclose(out2_bf, ref2, atol=5e-2, rtol=5e-2)

    print("KERNEL_OK")
</pallas_src>

<mosaic_0001>
module attributes {stable_mosaic.version = 11 : i64} {
  func.func @net_kernel(%arg0: i32, %arg1: memref<8x128xf32, #tpu.memory_space<vmem>>, %arg2: memref<128x128xf32, #tpu.memory_space<vmem>>, %arg3: memref<128x256xf32, #tpu.memory_space<vmem>>, %arg4: memref<1x256xf32, #tpu.memory_space<vmem>>, %arg5: memref<128x256xf32, #tpu.memory_space<vmem>>, %arg6: memref<128x256xf32, #tpu.memory_space<vmem>>, %arg7: memref<256x256xf32, #tpu.memory_space<vmem>>, %arg8: memref<1x256xf32, #tpu.memory_space<vmem>>, %arg9: memref<256x128xf32, #tpu.memory_space<vmem>>, %arg10: memref<1x128xf32, #tpu.memory_space<vmem>>, %arg11: memref<8x128xf32, #tpu.memory_space<vmem>>) attributes {dimension_semantics = [#tpu.dimension_semantics<parallel>], iteration_bounds = array<i64: 1>, scalar_prefetch = 0 : i64, scratch_operands = 0 : i64, tpu.core_type = #tpu.core_type<tc>, window_params = [{transform_indices = @transform_0, window_bounds = array<i64: 8, 128>}, {pipeline_mode = #tpu.pipeline_mode<synchronous>, transform_indices = @transform_1, window_bounds = array<i64: 128, 128>}, {pipeline_mode = #tpu.pipeline_mode<synchronous>, transform_indices = @transform_2, window_bounds = array<i64: 128, 256>}, {pipeline_mode = #tpu.pipeline_mode<synchronous>, transform_indices = @transform_3, window_bounds = array<i64: 1, 256>}, {pipeline_mode = #tpu.pipeline_mode<synchronous>, transform_indices = @transform_4, window_bounds = array<i64: 128, 256>}, {pipeline_mode = #tpu.pipeline_mode<synchronous>, transform_indices = @transform_5, window_bounds = array<i64: 128, 256>}, {pipeline_mode = #tpu.pipeline_mode<synchronous>, transform_indices = @transform_6, window_bounds = array<i64: 256, 256>}, {pipeline_mode = #tpu.pipeline_mode<synchronous>, transform_indices = @transform_7, window_bounds = array<i64: 1, 256>}, {pipeline_mode = #tpu.pipeline_mode<synchronous>, transform_indices = @transform_8, window_bounds = array<i64: 256, 128>}, {pipeline_mode = #tpu.pipeline_mode<synchronous>, transform_indices = @transform_9, window_bounds = array<i64: 1, 128>}, {transform_indices = @transform_10, window_bounds = array<i64: 8, 128>}]} {
    %c0 = arith.constant 0 : index
    %c0_0 = arith.constant 0 : index
    %0 = vector.load %arg1[%c0, %c0_0] : memref<8x128xf32, #tpu.memory_space<vmem>>, vector<8x128xf32>
    %c0_1 = arith.constant 0 : index
    %c0_2 = arith.constant 0 : index
    %1 = vector.load %arg2[%c0_1, %c0_2] : memref<128x128xf32, #tpu.memory_space<vmem>>, vector<128x128xf32>
    %cst = arith.constant dense<0.000000e+00> : vector<8x128xf32>
    %2 = tpu.matmul %0, %1, %cst {dimension_numbers = #tpu.dot_dimension_numbers<[1], [0], [0], [1], [0, 0, 1, 1], [], []>} : vector<8x128xf32>, vector<128x128xf32>, vector<8x128xf32> -> vector<8x128xf32>
    %cst_3 = arith.constant 0.000000e+00 : f32
    %3 = vector.broadcast %cst_3 : f32 to vector<8x128xf32>
    %4 = arith.maximumf %2, %3 : vector<8x128xf32>
    %5 = tpu.iota {dimensions = array<i32: 1>} : vector<8x128xi32>
    %6 = vector.extract_strided_slice %0 {offsets = [0, 0], sizes = [8, 1], strides = [1, 1]} : vector<8x128xf32> to vector<8x1xf32>
    %7 = arith.fptosi %6 : vector<8x1xf32> to vector<8x1xi32>
    %8 = vector.extract_strided_slice %0 {offsets = [0, 1], sizes = [8, 1], strides = [1, 1]} : vector<8x128xf32> to vector<8x1xf32>
    %9 = arith.fptosi %8 : vector<8x1xf32> to vector<8x1xi32>
    %10 = vector.extract_strided_slice %0 {offsets = [0, 2], sizes = [8, 1], strides = [1, 1]} : vector<8x128xf32> to vector<8x1xf32>
    %11 = arith.fptosi %10 : vector<8x1xf32> to vector<8x1xi32>
    %12 = vector.extract_strided_slice %0 {offsets = [0, 3], sizes = [8, 1], strides = [1, 1]} : vector<8x128xf32> to vector<8x1xf32>
    %13 = arith.fptosi %12 : vector<8x1xf32> to vector<8x1xi32>
    %14 = vector.broadcast %7 : vector<8x1xi32> to vector<8x128xi32>
    %15 = arith.cmpi eq, %5, %14 : vector<8x128xi32>
    %16 = arith.extui %15 : vector<8x128xi1> to vector<8x128xi32>
    %17 = arith.sitofp %16 : vector<8x128xi32> to vector<8x128xf32>
    %18 = vector.broadcast %9 : vector<8x1xi32> to vector<8x128xi32>
    %19 = arith.cmpi eq, %5, %18 : vector<8x128xi32>
    %20 = arith.extui %19 : vector<8x128xi1> to vector<8x128xi32>
    %21 = arith.sitofp %20 : vector<8x128xi32> to vector<8x128xf32>
    %22 = arith.addf %17, %21 : vector<8x128xf32>
    %23 = vector.broadcast %11 : vector<8x1xi32> to vector<8x128xi32>
    %24 = arith.cmpi eq, %5, %23 : vector<8x128xi32>
    %25 = arith.extui %24 : vector<8x128xi1> to vector<8x128xi32>
    %26 = arith.sitofp %25 : vector<8x128xi32> to vector<8x128xf32>
    %27 = vector.broadcast %13 : vector<8x1xi32> to vector<8x128xi32>
    %28 = arith.cmpi eq, %5, %27 : vector<8x128xi32>
    %29 = arith.extui %28 : vector<8x128xi1> to vector<8x128xi32>
    %30 = arith.sitofp %29 : vector<8x128xi32> to vector<8x128xf32>
    %31 = arith.addf %26, %30 : vector<8x128xf32>
    %c0_4 = arith.constant 0 : index
    %c0_5 = arith.constant 0 : index
    %32 = vector.load %arg3[%c0_4, %c0_5] : memref<128x256xf32, #tpu.memory_space<vmem>>, vector<128x256xf32>
    %cst_6 = arith.constant dense<0.000000e+00> : vector<8x256xf32>
    %33 = tpu.matmul %4, %32, %cst_6 {dimension_numbers = #tpu.dot_dimension_numbers<[1], [0], [0], [1], [0, 0, 1, 1], [], []>} : vector<8x128xf32>, vector<128x256xf32>, vector<8x256xf32> -> vector<8x256xf32>
    %c0_7 = arith.constant 0 : index
    %c0_8 = arith.constant 0 : index
    %34 = vector.load %arg5[%c0_7, %c0_8] : memref<128x256xf32, #tpu.memory_space<vmem>>, vector<128x256xf32>
    %cst_9 = arith.constant dense<0.000000e+00> : vector<8x256xf32>
    %35 = tpu.matmul %22, %34, %cst_9 {dimension_numbers = #tpu.dot_dimension_numbers<[1], [0], [0], [1], [0, 0, 1, 1], [], []>} : vector<8x128xf32>, vector<128x256xf32>, vector<8x256xf32> -> vector<8x256xf32>
    %36 = arith.addf %33, %35 : vector<8x256xf32>
    %c0_10 = arith.constant 0 : index
    %c0_11 = arith.constant 0 : index
    %37 = vector.load %arg6[%c0_10, %c0_11] : memref<128x256xf32, #tpu.memory_space<vmem>>, vector<128x256xf32>
    %cst_12 = arith.constant dense<0.000000e+00> : vector<8x256xf32>
    %38 = tpu.matmul %31, %37, %cst_12 {dimension_numbers = #tpu.dot_dimension_numbers<[1], [0], [0], [1], [0, 0, 1, 1], [], []>} : vector<8x128xf32>, vector<128x256xf32>, vector<8x256xf32> -> vector<8x256xf32>
    %39 = arith.addf %36, %38 : vector<8x256xf32>
    %c0_13 = arith.constant 0 : index
    %c0_14 = arith.constant 0 : index
    %40 = vector.load %arg4[%c0_13, %c0_14] : memref<1x256xf32, #tpu.memory_space<vmem>>, vector<1x256xf32>
    %41 = vector.broadcast %40 : vector<1x256xf32> to vector<8x256xf32>
    %42 = arith.addf %39, %41 : vector<8x256xf32>
    %cst_15 = arith.constant 0.000000e+00 : f32
    %43 = vector.broadcast %cst_15 : f32 to vector<8x256xf32>
    %44 = arith.maximumf %42, %43 : vector<8x256xf32>
    %c0_16 = arith.constant 0 : index
    %c0_17 = arith.constant 0 : index
    %45 = vector.load %arg7[%c0_16, %c0_17] : memref<256x256xf32, #tpu.memory_space<vmem>>, vector<256x256xf32>
    %cst_18 = arith.constant dense<0.000000e+00> : vector<8x256xf32>
    %46 = tpu.matmul %44, %45, %cst_18 {dimension_numbers = #tpu.dot_dimension_numbers<[1], [0], [0], [1], [0, 0, 1, 1], [], []>} : vector<8x256xf32>, vector<256x256xf32>, vector<8x256xf32> -> vector<8x256xf32>
    %c0_19 = arith.constant 0 : index
    %c0_20 = arith.constant 0 : index
    %47 = vector.load %arg8[%c0_19, %c0_20] : memref<1x256xf32, #tpu.memory_space<vmem>>, vector<1x256xf32>
    %48 = vector.broadcast %47 : vector<1x256xf32> to vector<8x256xf32>
    %49 = arith.addf %46, %48 : vector<8x256xf32>
    %cst_21 = arith.constant 0.000000e+00 : f32
    %50 = vector.broadcast %cst_21 : f32 to vector<8x256xf32>
    %51 = arith.maximumf %49, %50 : vector<8x256xf32>
    %c0_22 = arith.constant 0 : index
    %c0_23 = arith.constant 0 : index
    %52 = vector.load %arg9[%c0_22, %c0_23] : memref<256x128xf32, #tpu.memory_space<vmem>>, vector<256x128xf32>
    %cst_24 = arith.constant dense<0.000000e+00> : vector<8x128xf32>
    %53 = tpu.matmul %51, %52, %cst_24 {dimension_numbers = #tpu.dot_dimension_numbers<[1], [0], [0], [1], [0, 0, 1, 1], [], []>} : vector<8x256xf32>, vector<256x128xf32>, vector<8x128xf32> -> vector<8x128xf32>
    %c0_25 = arith.constant 0 : index
    %c0_26 = arith.constant 0 : index
    %54 = vector.load %arg10[%c0_25, %c0_26] : memref<1x128xf32, #tpu.memory_space<vmem>>, vector<1x128xf32>
    %55 = vector.broadcast %54 : vector<1x128xf32> to vector<8x128xf32>
    %56 = arith.addf %53, %55 : vector<8x128xf32>
    %c0_27 = arith.constant 0 : index
    %c0_28 = arith.constant 0 : index
    %57 = vector.load %arg11[%c0_27, %c0_28] : memref<8x128xf32, #tpu.memory_space<vmem>>, vector<8x128xf32>
    tpu.vector_store %arg11[%c0_27, %c0_28], %56 {strides = array<i32>} : memref<8x128xf32, #tpu.memory_space<vmem>>, vector<8x128xf32>,
    return
  }
  func.func @transform_0(%arg0: i32) -> (i32, i32) {
    %c0_i32 = arith.constant 0 : i32
    %c0_i32_0 = arith.constant 0 : i32
    return %arg0, %c0_i32 : i32, i32
  }
  func.func @transform_1(%arg0: i32) -> (i32, i32) {
    %c0_i32 = arith.constant 0 : i32
    %c0_i32_0 = arith.constant 0 : i32
    %c0_i32_1 = arith.constant 0 : i32
    return %c0_i32, %c0_i32_0 : i32, i32
  }
  func.func @transform_2(%arg0: i32) -> (i32, i32) {
    %c0_i32 = arith.constant 0 : i32
    %c0_i32_0 = arith.constant 0 : i32
    %c0_i32_1 = arith.constant 0 : i32
    return %c0_i32, %c0_i32_0 : i32, i32
  }
  func.func @transform_3(%arg0: i32) -> (i32, i32) {
    %c0_i32 = arith.constant 0 : i32
    %c0_i32_0 = arith.constant 0 : i32
    %c0_i32_1 = arith.constant 0 : i32
    return %c0_i32, %c0_i32_0 : i32, i32
  }
  func.func @transform_4(%arg0: i32) -> (i32, i32) {
    %c0_i32 = arith.constant 0 : i32
    %c0_i32_0 = arith.constant 0 : i32
    %c0_i32_1 = arith.constant 0 : i32
    return %c0_i32, %c0_i32_0 : i32, i32
  }
  func.func @transform_5(%arg0: i32) -> (i32, i32) {
    %c0_i32 = arith.constant 0 : i32
    %c0_i32_0 = arith.constant 0 : i32
    %c0_i32_1 = arith.constant 0 : i32
    return %c0_i32, %c0_i32_0 : i32, i32
  }
  func.func @transform_6(%arg0: i32) -> (i32, i32) {
    %c0_i32 = arith.constant 0 : i32
    %c0_i32_0 = arith.constant 0 : i32
    %c0_i32_1 = arith.constant 0 : i32
    return %c0_i32, %c0_i32_0 : i32, i32
  }
  func.func @transform_7(%arg0: i32) -> (i32, i32) {
    %c0_i32 = arith.constant 0 : i32
    %c0_i32_0 = arith.constant 0 : i32
    %c0_i32_1 = arith.constant 0 : i32
    return %c0_i32, %c0_i32_0 : i32, i32
  }
  func.func @transform_8(%arg0: i32) -> (i32, i32) {
    %c0_i32 = arith.constant 0 : i32
    %c0_i32_0 = arith.constant 0 : i32
    %c0_i32_1 = arith.constant 0 : i32
    return %c0_i32, %c0_i32_0 : i32, i32
  }
  func.func @transform_9(%arg0: i32) -> (i32, i32) {
    %c0_i32 = arith.constant 0 : i32
    %c0_i32_0 = arith.constant 0 : i32
    %c0_i32_1 = arith.constant 0 : i32
    return %c0_i32, %c0_i32_0 : i32, i32
  }
  func.func @transform_10(%arg0: i32) -> (i32, i32) {
    %c0_i32 = arith.constant 0 : i32
    %c0_i32_0 = arith.constant 0 : i32
    return %arg0, %c0_i32 : i32, i32
  }
}

</mosaic_0001>

<bundles_post_ra>
// kernel: tpu_custom_call.1
= control target key start
LH: loop header
LB: loop body
LE: loop exit
PB: predicated region body
PF: predicated region fallthrough
CT: control target
= control target key end

     0   :  { %15 = vsyncpa [#allocation3], 0  ;;  %s1611_s0 = inlined_call_operand.hbm [shape: f32[8,128], index: 0, kind: input, shape index: {}]   ;;  %s1612_s1 = inlined_call_operand.hbm [shape: f32[128,128], index: 1, kind: input, shape index: {}]   ;;  %s1613_s2 = inlined_call_operand.hbm [shape: f32[128,256], index: 2, kind: input, shape index: {}]   ;;  %s1614_s3 = inlined_call_operand.vmem [shape: f32[1,256], index: 3, kind: input, shape index: {}]   ;;  %s1615_s4 = inlined_call_operand.hbm [shape: f32[128,256], index: 4, kind: input, shape index: {}]   ;;  %s1616_s5 = inlined_call_operand.hbm [shape: f32[128,256], index: 5, kind: input, shape index: {}]   ;;  %s1617_s6 = inlined_call_operand.hbm [shape: f32[256,256], index: 6, kind: input, shape index: {}]   ;;  %s1618_s7 = inlined_call_operand.vmem [shape: f32[1,256], index: 7, kind: input, shape index: {}]   ;;  %s1619_s8 = inlined_call_operand.hbm [shape: f32[256,128], index: 8, kind: input, shape index: {}]   ;;  %s1620_s9 = inlined_call_operand.vmem [shape: f32[1,128], index: 9, kind: input, shape index: {}]   ;;  %s1621_s10 = inlined_call_operand.hbm [shape: f32[8,128], index: 10, kind: output, shape index: {}]  }
   0x1   :  { %16 = vsyncpa [#allocation6], 0 }
   0x2   :  { %17 = vsyncpa [#allocation9], 0 }
   0x3   :  { %18 = vsyncpa [#allocation12], 0 }
   0x4   :  { %19 = vsyncpa [#allocation4], 0  ;;  %s1374_s13 = smov [#allocation5]   ;;  %s1188_s17 = scalar_lea.hbm %s1612_s1, 2048 }
   0x5   :  { %s35_s14 = sshll.u32 %s1374_s13, 4  ;;  %p1189_p0 = scmp.ne.s32.totalorder %s1612_s1, %s1188_s17  ;;  %s36_s14 = int_to_ptr.vmem [resolvable:$true] %s35_s14 }
   0x6   :  { %p1192_p1 = scmp.lt.u32.totalorder %s1188_s17, %s1612_s1 }
   0x8   :  { %p1194_p2 = pnand %p1192_p1, %p1189_p0 }
   0xa   :  { %1197 = shalt.err (!%p1194_p2)
}
   0xb   :  { %s1198_s22 = scalar_lea.vmem %s36_s14, 2048  ;;  %p1203_p4 = scmp.lt.s32.totalorder %s36_s14, %s36_s14 }
   0xc   :  { %p1199_p3 = scmp.ne.s32.totalorder %s36_s14, %s1198_s22  ;;  %p1204_p5 = scmp.lt.s32.totalorder %s1198_s22, %s1198_s22 }
   0xe   :  { %p1205_p6 = por %p1204_p5, %p1203_p4 }
  0x10   :  { %p1206_p7 = pnand %p1205_p6, %p1199_p3 }
  0x12   :  { %1209 = shalt.err (!%p1206_p7)
}
  0x13   :  { %s1375_s23 = smov 128   ;;  %s1376_s24 = smov 8  }
  0x14   :  { %41 = dma.hbm_to_vmem [thread:$0]  %s1612_s1, 2048, %s36_s14, [#allocation6], %s1375_s23, %s1375_s23, %s1376_s24  }
  0x15   :  { %s1377_s27 = smov [#allocation8]   ;;  %s1378_s29 = smov [#allocation11]  }
  0x16   :  { %s61_s28 = sshll.u32 %s1377_s27, 4  ;;  %s85_s30 = sshll.u32 %s1378_s29, 4  ;;  %s62_s28 = int_to_ptr.vmem [resolvable:$true] %s61_s28  ;;  %s86_s30 = int_to_ptr.vmem [resolvable:$true] %s85_s30 }
  0x17   :  { %s1210_s13 = scalar_lea.hbm %s1615_s4, 4096 }
  0x18   :  { %p1211_p8 = scmp.ne.s32.totalorder %s1615_s4, %s1210_s13  ;;  %p1214_p9 = scmp.lt.u32.totalorder %s1210_s13, %s1615_s4 }
  0x1a   :  { %p1216_p10 = pnand %p1214_p9, %p1211_p8 }
  0x1c   :  { %1219 = shalt.err (!%p1216_p10)
}
  0x1d   :  { %s1220_s1 = scalar_lea.vmem %s62_s28, 4096  ;;  %p1225_p12 = scmp.lt.s32.totalorder %s62_s28, %s62_s28 }
  0x1e   :  { %p1221_p11 = scmp.ne.s32.totalorder %s62_s28, %s1220_s1  ;;  %p1226_p13 = scmp.lt.s32.totalorder %s1220_s1, %s1220_s1 }
  0x20   :  { %p1227_p0 = por %p1226_p13, %p1225_p12 }
  0x22   :  { %p1228_p1 = pnand %p1227_p0, %p1221_p11 }
  0x24   :  { %1231 = shalt.err (!%p1228_p1)
}
  0x25   :  { %s1379_s14 = smov 256   ;;  %s1380_s19 = smov 16  }
  0x26   :  { %67 = dma.hbm_to_vmem [thread:$0]  %s1615_s4, 4096, %s62_s28, [#allocation9], %s1379_s14, %s1379_s14, %s1380_s19  }
  0x27   :  { %s1232_s26 = scalar_lea.hbm %s1617_s6, 8192 }
  0x28   :  { %p1233_p2 = scmp.ne.s32.totalorder %s1617_s6, %s1232_s26  ;;  %p1236_p3 = scmp.lt.u32.totalorder %s1232_s26, %s1617_s6 }
  0x2a   :  { %p1238_p4 = pnand %p1236_p3, %p1233_p2 }
  0x2c   :  { %1241 = shalt.err (!%p1238_p4)
}
  0x2d   :  { %s1242_s13 = scalar_lea.vmem %s86_s30, 8192  ;;  %p1247_p6 = scmp.lt.s32.totalorder %s86_s30, %s86_s30 }
  0x2e   :  { %p1243_p5 = scmp.ne.s32.totalorder %s86_s30, %s1242_s13  ;;  %p1248_p7 = scmp.lt.s32.totalorder %s1242_s13, %s1242_s13 }
  0x30   :  { %p1249_p8 = por %p1248_p7, %p1247_p6 }
  0x32   :  { %p1250_p9 = pnand %p1249_p8, %p1243_p5 }
  0x34   :  { %1253 = shalt.err (!%p1250_p9)
}
  0x35   :  { %91 = dma.hbm_to_vmem [thread:$0]  %s1617_s6, 8192, %s86_s30, [#allocation12], %s1379_s14, %s1379_s14, %s1380_s19  }
  0x36   :  { %s1381_s15 = smov [#allocation2]   ;;  %s1382_s17 = smov [#allocation7]  }
  0x37   :  { %s26_s16 = sshll.u32 %s1381_s15, 4  ;;  %s47_s18 = sshll.u32 %s1382_s17, 4  ;;  %s27_s16 = int_to_ptr.vmem [resolvable:$true] %s26_s16  ;;  %s48_s18 = int_to_ptr.vmem [resolvable:$true] %s47_s18 }
  0x38   :  { %s1254_s21 = scalar_lea.hbm %s1611_s0, 128 }
  0x39   :  { %p1255_p10 = scmp.ne.s32.totalorder %s1611_s0, %s1254_s21  ;;  %p1258_p11 = scmp.lt.u32.totalorder %s1254_s21, %s1611_s0 }
  0x3b   :  { %p1260_p12 = pnand %p1258_p11, %p1255_p10 }
  0x3d   :  { %1263 = shalt.err (!%p1260_p12)
}
  0x3e   :  { %s1264_s6 = scalar_lea.vmem %s27_s16, 128  ;;  %p1269_p0 = scmp.lt.s32.totalorder %s27_s16, %s27_s16 }
  0x3f   :  { %p1265_p13 = scmp.ne.s32.totalorder %s27_s16, %s1264_s6  ;;  %p1270_p1 = scmp.lt.s32.totalorder %s1264_s6, %s1264_s6 }
  0x41   :  { %p1271_p2 = por %p1270_p1, %p1269_p0 }
  0x43   :  { %p1272_p3 = pnand %p1271_p2, %p1265_p13 }
  0x45   :  { %1275 = shalt.err (!%p1272_p3)
}
  0x46   :  { %29 = dma.hbm_to_vmem [thread:$0]  %s1611_s0, 128, %s27_s16, [#allocation3]  }
  0x47   :  { %s1276_s13 = scalar_lea.hbm %s1613_s2, 4096 }
  0x48   :  { %p1277_p4 = scmp.ne.s32.totalorder %s1613_s2, %s1276_s13  ;;  %p1280_p5 = scmp.lt.u32.totalorder %s1276_s13, %s1613_s2 }
  0x4a   :  { %p1282_p6 = pnand %p1280_p5, %p1277_p4 }
  0x4c   :  { %1285 = shalt.err (!%p1282_p6)
}
  0x4d   :  { %s1286_s1 = scalar_lea.vmem %s48_s18, 4096  ;;  %p1291_p8 = scmp.lt.s32.totalorder %s48_s18, %s48_s18 }
  0x4e   :  { %p1287_p7 = scmp.ne.s32.totalorder %s48_s18, %s1286_s1  ;;  %p1292_p9 = scmp.lt.s32.totalorder %s1286_s1, %s1286_s1 }
  0x50   :  { %p1293_p10 = por %p1292_p9, %p1291_p8 }
  0x52   :  { %p1294_p11 = pnand %p1293_p10, %p1287_p7 }
  0x54   :  { %1297 = shalt.err (!%p1294_p11)
}
  0x55   :  { %53 = dma.hbm_to_vmem [thread:$0]  %s1613_s2, 4096, %s48_s18, [#allocation6], %s1379_s14, %s1379_s14, %s1380_s19  }
  0x56   :  { %s1383_s20 = smov [#allocation10]   ;;  %s1384_s22 = smov [#allocation13]  }
  0x57   :  { %s73_s21 = sshll.u32 %s1383_s20, 4  ;;  %s99_s25 = sshll.u32 %s1384_s22, 4  ;;  %s74_s21 = int_to_ptr.vmem [resolvable:$true] %s73_s21  ;;  %s100_s25 = int_to_ptr.vmem [resolvable:$true] %s99_s25 }
  0x58   :  { %s1298_s6 = scalar_lea.hbm %s1616_s5, 4096 }
  0x59   :  { %p1299_p12 = scmp.ne.s32.totalorder %s1616_s5, %s1298_s6  ;;  %p1302_p13 = scmp.lt.u32.totalorder %s1298_s6, %s1616_s5 }
  0x5b   :  { %p1304_p0 = pnand %p1302_p13, %p1299_p12 }
  0x5d   :  { %1307 = shalt.err (!%p1304_p0)
}
  0x5e   :  { %s1308_s2 = scalar_lea.vmem %s74_s21, 4096  ;;  %p1313_p2 = scmp.lt.s32.totalorder %s74_s21, %s74_s21 }
  0x5f   :  { %p1309_p1 = scmp.ne.s32.totalorder %s74_s21, %s1308_s2  ;;  %p1314_p3 = scmp.lt.s32.totalorder %s1308_s2, %s1308_s2 }
  0x61   :  { %p1315_p4 = por %p1314_p3, %p1313_p2 }
  0x63   :  { %p1316_p5 = pnand %p1315_p4, %p1309_p1 }
  0x65   :  { %1319 = shalt.err (!%p1316_p5)
}
  0x66   :  { %79 = dma.hbm_to_vmem [thread:$0]  %s1616_s5, 4096, %s74_s21, [#allocation9], %s1379_s14, %s1379_s14, %s1380_s19  }
  0x67   :  { %s1320_s15 = scalar_lea.hbm %s1619_s8, 4096 }
  0x68   :  { %p1321_p6 = scmp.ne.s32.totalorder %s1619_s8, %s1320_s15  ;;  %p1324_p7 = scmp.lt.u32.totalorder %s1320_s15, %s1619_s8 }
  0x6a   :  { %p1326_p8 = pnand %p1324_p7, %p1321_p6 }
  0x6c   :  { %1329 = shalt.err (!%p1326_p8)
}
  0x6d   :  { %s1330_s20 = scalar_lea.vmem %s100_s25, 4096  ;;  %p1335_p10 = scmp.lt.s32.totalorder %s100_s25, %s100_s25 }
  0x6e   :  { %p1331_p9 = scmp.ne.s32.totalorder %s100_s25, %s1330_s20  ;;  %p1336_p11 = scmp.lt.s32.totalorder %s1330_s20, %s1330_s20 }
  0x70   :  { %p1337_p12 = por %p1336_p11, %p1335_p10 }
  0x72   :  { %p1338_p13 = pnand %p1337_p12, %p1331_p9 }
  0x74   :  { %1341 = shalt.err (!%p1338_p13)
}
  0x75   :  { %105 = dma.hbm_to_vmem [thread:$0]  %s1619_s8, 4096, %s100_s25, [#allocation12], %s1375_s23, %s1375_s23, %s1376_s24  }
  0x76   :  { %1364 = dma.done.wait [#allocation3], 128  }
  0x77   :  { %1365 = vsyncadd [#allocation3], 4294967168 }
  0x78   :  { %1366 = dma.done.wait [#allocation6], 6144  }
  0x79   :  { %1367 = vsyncadd [#allocation6], 4294961152 }
  0x7a   :  { %1368 = dma.done.wait [#allocation9], 8192  }
  0x7b   :  { %1369 = vsyncadd [#allocation9], 4294959104 }
  0x7c   :  { %1370 = dma.done.wait [#allocation12], 12288  }
  0x7d   :  { %1371 = vsyncadd [#allocation12], 4294955008  ;;  %v1385_v0 = vmov 0.0|0.0   ;;  %vm1386_vm0 = vmmov 0   ;;  %v1387_v1 = vmov 0.0   ;;  %v1388_v2 = vmov 0  }
  0x7e   :  { %942 = vmatprep.subr.bf16.mxu0 %v1385_v0  ;;  %939 = vmatprep.mubr.msk.f32.mxu0 %vm1386_vm0, %v1387_v1  ;;  %v1389_v3 = vmov 2   ;;  %v130_v4 = vld [vmem:[#allocation5] sm:$0xff]  ;;  %v131_v5 = vld [vmem:[#allocation5 + $0x8] sm:$0xff]  ;;  %v132_v6 = vld [vmem:[#allocation5 + $0x10] sm:$0xff]  ;;  %v1390_v35 = vmov 1   ;;  %v1391_v36 = vmov 3  }
  0x7f   :  { %1183 = vset.pattern.permute.xlu0 %v1388_v2  ;;  %1185 = vset.pattern.permute.xlu1 %v1389_v3  ;;  %v943_v7 = vpack.c.bf16 %v131_v5, %v130_v4  ;;  %v133_v8 = vld [vmem:[#allocation5 + $0x18] sm:$0xff]  ;;  %v134_v10 = vld [vmem:[#allocation5 + $0x20] sm:$0xff]  ;;  %v135_v11 = vld [vmem:[#allocation5 + $0x28] sm:$0xff] }
  0x80   :  { %374 = vmatprep.mubr.f32.mxu1 %v1387_v1  ;;  %v946_v9 = vpack.c.bf16 %v133_v8, %v132_v6  ;;  %v1554_v12 = vld [vmem:[#allocation2] sm:$0xff]  ;;  %v279_v13 = vld [vmem:[#allocation8 + $0x8] sm:$0xff]  ;;  %v278_v16 = vld [vmem:[#allocation8] sm:$0xff]  ;;  %v949_v18 = vpack.c.bf16 %v135_v11, %v134_v10 }
  0x81   :  { %944 = vmatpush3.bf16.msra.mxu0 %v943_v7  ;;  %v1162_v14 = vtrunc.f32 %v1554_v12  ;;  %v281_v15 = vld [vmem:[#allocation8 + $0x18] sm:$0xff]  ;;  %v280_v17 = vld [vmem:[#allocation8 + $0x10] sm:$0xff]  ;;  %v283_v21 = vld [vmem:[#allocation8 + $0x28] sm:$0xff] }
  0x82   :  { %945 = vmatprep.subr.bf16.mxu0 %v1385_v0  ;;  %v966_v19 = vpack.c.bf16 %v281_v15, %v279_v13  ;;  %v968_v20 = vpack.c.bf16 %v280_v17, %v278_v16  ;;  %v285_v22 = vld [vmem:[#allocation8 + $0x38] sm:$0xff]  ;;  %v136_v23 = vld [vmem:[#allocation5 + $0x30] sm:$0xff]  ;;  %v282_v27 = vld [vmem:[#allocation8 + $0x20] sm:$0xff] }
  0x83   :  { %v137_v24 = vld [vmem:[#allocation5 + $0x38] sm:$0xff]  ;;  %v1163_v25 = vcvt.f32.s32 %v1162_v14  ;;  %v970_v26 = vpack.c.bf16 %v285_v22, %v283_v21  ;;  %v284_v28 = vld [vmem:[#allocation8 + $0x30] sm:$0xff]  ;;  %v287_v30 = vld [vmem:[#allocation8 + $0x48] sm:$0xff]  ;;  %v217_v22 = vlaneseq }
  0x84   :  { %967 = vmatprep.subr.bf16.mxu1 %v966_v19  ;;  %v952_v29 = vpack.c.bf16 %v137_v24, %v136_v23  ;;  %v289_v31 = vld [vmem:[#allocation8 + $0x58] sm:$0xff]  ;;  %v138_v32 = vld [vmem:[#allocation5 + $0x40] sm:$0xff]  ;;  %v139_v33 = vld [vmem:[#allocation5 + $0x48] sm:$0xff]  ;;  %v972_v34 = vpack.c.bf16 %v284_v28, %v282_v27 }
  0x85   :  { %947 = vmatpush3.bf16.msra.mxu0 %v946_v9  ;;  %221 = vperm.xlu0 %1183, %v1163_v25   ;;  %v974_v37 = vpack.c.bf16 %v289_v31, %v287_v30  ;;  %v286_v38 = vld [vmem:[#allocation8 + $0x40] sm:$0xff]  ;;  %v288_v39 = vld [vmem:[#allocation8 + $0x50] sm:$0xff]  ;;  %v955_v40 = vpack.c.bf16 %v139_v33, %v138_v32  ;;  %v291_v41 = vld [vmem:[#allocation8 + $0x68] sm:$0xff]  ;;  %v1565_v23 = vand.u32 127, %v217_v22 }
  0x86   :  { %948 = vmatprep.subr.bf16.mxu0 %v1385_v0  ;;  %234 = vperm.xlu1 %1185, %v1163_v25   ;;  %v293_v42 = vld [vmem:[#allocation8 + $0x78] sm:$0xff]  ;;  %v140_v43 = vld [vmem:[#allocation5 + $0x50] sm:$0xff]  ;;  %v976_v45 = vpack.c.bf16 %v288_v39, %v286_v38  ;;  %v290_v47 = vld [vmem:[#allocation8 + $0x60] sm:$0xff] }
  0x87   :  { %969 = vmatpush1.bf16.msra.mxu1 %v968_v20  ;;  %v141_v44 = vld [vmem:[#allocation5 + $0x58] sm:$0xff]  ;;  %v978_v46 = vpack.c.bf16 %v293_v42, %v291_v41  ;;  %v292_v48 = vld [vmem:[#allocation8 + $0x70] sm:$0xff]  ;;  %v295_v50 = vld [vmem:[#allocation8 + $0x88] sm:$0xff] }
  0x88   :  { %971 = vmatprep.subr.bf16.mxu1 %v970_v26  ;;  %v958_v49 = vpack.c.bf16 %v141_v44, %v140_v43  ;;  %v297_v51 = vld [vmem:[#allocation8 + $0x98] sm:$0xff]  ;;  %v142_v52 = vld [vmem:[#allocation5 + $0x60] sm:$0xff]  ;;  %v143_v53 = vld [vmem:[#allocation5 + $0x68] sm:$0xff]  ;;  %v980_v54 = vpack.c.bf16 %v292_v48, %v290_v47 }
  0x89   :  { %950 = vmatpush3.bf16.msra.mxu0 %v949_v18  ;;  %1184 = vset.pattern.permute.xlu0 %v1390_v35  ;;  %v982_v55 = vpack.c.bf16 %v297_v51, %v295_v50  ;;  %v294_v56 = vld [vmem:[#allocation8 + $0x80] sm:$0xff]  ;;  %v296_v57 = vld [vmem:[#allocation8 + $0x90] sm:$0xff]  ;;  %v961_v58 = vpack.c.bf16 %v143_v53, %v142_v52  ;;  %v299_v59 = vld [vmem:[#allocation8 + $0xa8] sm:$0xff] }
  0x8a   :  { %951 = vmatprep.subr.bf16.mxu0 %v1385_v0  ;;  %1186 = vset.pattern.permute.xlu1 %v1391_v36  ;;  %v301_v60 = vld [vmem:[#allocation8 + $0xb8] sm:$0xff]  ;;  %v144_v61 = vld [vmem:[#allocation5 + $0x70] sm:$0xff]  ;;  %v984_v63 = vpack.c.bf16 %v296_v57, %v294_v56  ;;  %v298_v3 = vld [vmem:[#allocation8 + $0xa0] sm:$0xff] }
  0x8b   :  { %227 = vperm.xlu0 %1184, %v1163_v25   ;;  %240 = vperm.xlu1 %1186, %v1163_v25   ;;  %v145_v62 = vld [vmem:[#allocation5 + $0x78] sm:$0xff]  ;;  %v986_v2 = vpack.c.bf16 %v301_v60, %v299_v59  ;;  %v300_v4 = vld [vmem:[#allocation8 + $0xb0] sm:$0xff]  ;;  %v303_v6 = vld [vmem:[#allocation8 + $0xc8] sm:$0xff] }
  0x8c   :  { %973 = vmatpush1.bf16.msra.mxu1 %v972_v34  ;;  %v964_v5 = vpack.c.bf16 %v145_v62, %v144_v61  ;;  %v305_v7 = vld [vmem:[#allocation8 + $0xd8] sm:$0xff]  ;;  %v988_v8 = vpack.c.bf16 %v300_v4, %v298_v3  ;;  %v302_v10 = vld [vmem:[#allocation8 + $0xc0] sm:$0xff]  ;;  %v304_v11 = vld [vmem:[#allocation8 + $0xd0] sm:$0xff] }
  0x8d   :  { %953 = vmatpush3.bf16.msra.mxu0 %v952_v29  ;;  %975 = vmatprep.subr.bf16.mxu1 %v974_v37  ;;  %v990_v9 = vpack.c.bf16 %v305_v7, %v303_v6  ;;  %v307_v13 = vld [vmem:[#allocation8 + $0xe8] sm:$0xff]  ;;  %v309_v14 = vld [vmem:[#allocation8 + $0xf8] sm:$0xff]  ;;  %v992_v15 = vpack.c.bf16 %v304_v11, %v302_v10  ;;  %v306_v17 = vld [vmem:[#allocation8 + $0xe0] sm:$0xff] }
  0x8e   :  { %954 = vmatprep.subr.bf16.mxu0 %v1385_v0  ;;  %v994_v16 = vpack.c.bf16 %v309_v14, %v307_v13  ;;  %v308_v18 = vld [vmem:[#allocation8 + $0xf0] sm:$0xff]  ;;  %v247_v19 = vld [vmem:[#allocation7 + $0x8] sm:$0xff]  ;;  %v249_v20 = vld [vmem:[#allocation7 + $0x18] sm:$0xff] }
  0x8f   :  { %1187 = vset.pattern.permute.xlu0 %v1391_v36  ;;  %v998_v21 = vpack.c.bf16 %v249_v20, %v247_v19  ;;  %v248_v25 = vld [vmem:[#allocation7 + $0x10] sm:$0xff]  ;;  %v251_v28 = vld [vmem:[#allocation7 + $0x28] sm:$0xff]  ;;  %v253_v29 = vld [vmem:[#allocation7 + $0x38] sm:$0xff] }
  0x90   :  { %977 = vmatpush1.bf16.msra.mxu1 %v976_v45  ;;  %v1002_v33 = vpack.c.bf16 %v253_v29, %v251_v28  ;;  %v250_v34 = vld [vmem:[#allocation7 + $0x20] sm:$0xff]  ;;  %v252_v35 = vld [vmem:[#allocation7 + $0x30] sm:$0xff]  ;;  %v255_v36 = vld [vmem:[#allocation7 + $0x48] sm:$0xff] }
  0x91   :  { %956 = vmatpush3.bf16.msra.mxu0 %v955_v40  ;;  %979 = vmatprep.subr.bf16.mxu1 %v978_v46  ;;  %v257_v37 = vld [vmem:[#allocation7 + $0x58] sm:$0xff]  ;;  %v1004_v38 = vpack.c.bf16 %v252_v35, %v250_v34  ;;  %v254_v40 = vld [vmem:[#allocation7 + $0x40] sm:$0xff]  ;;  %v256_v41 = vld [vmem:[#allocation7 + $0x50] sm:$0xff] }
  0x92   :  { %957 = vmatprep.subr.bf16.mxu0 %v1385_v0  ;;  %v1006_v39 = vpack.c.bf16 %v257_v37, %v255_v36  ;;  %v259_v42 = vld [vmem:[#allocation7 + $0x68] sm:$0xff]  ;;  %v261_v43 = vld [vmem:[#allocation7 + $0x78] sm:$0xff]  ;;  %v258_v44 = vld [vmem:[#allocation7 + $0x60] sm:$0xff]  ;;  %v1008_v46 = vpack.c.bf16 %v256_v41, %v254_v40 }
  0x93   :  { %v260_v45 = vld [vmem:[#allocation7 + $0x70] sm:$0xff]  ;;  %v263_v47 = vld [vmem:[#allocation7 + $0x88] sm:$0xff]  ;;  %v265_v48 = vld [vmem:[#allocation7 + $0x98] sm:$0xff]  ;;  %v1010_v52 = vpack.c.bf16 %v261_v43, %v259_v42 }
  0x94   :  { %981 = vmatpush1.bf16.msra.mxu1 %v980_v54  ;;  %v576_v50 = vld [vmem:[#allocation11 + $0x18] sm:$0xff]  ;;  %v573_v51 = vld [vmem:[#allocation11] sm:$0xff]  ;;  %v575_v54 = vld [vmem:[#allocation11 + $0x10] sm:$0xff] }
  0x95   :  { %959 = vmatpush3.bf16.msra.mxu0 %v958_v49  ;;  %983 = vmatprep.subr.bf16.mxu1 %v982_v55  ;;  %v574_v49 = vld [vmem:[#allocation11 + $0x8] sm:$0xff]  ;;  %v580_v56 = vld [vmem:[#allocation11 + $0x38] sm:$0xff]  ;;  %v1064_v57 = vpack.c.bf16 %v575_v54, %v573_v51  ;;  %v577_v59 = vld [vmem:[#allocation11 + $0x20] sm:$0xff] }
  0x96   :  { %960 = vmatprep.subr.bf16.mxu0 %v1385_v0  ;;  %v1062_v53 = vpack.c.bf16 %v576_v50, %v574_v49  ;;  %v578_v55 = vld [vmem:[#allocation11 + $0x28] sm:$0xff]  ;;  %v579_v60 = vld [vmem:[#allocation11 + $0x30] sm:$0xff]  ;;  %v584_v62 = vld [vmem:[#allocation11 + $0x58] sm:$0xff] }
  0x97   :  { %v582_v61 = vld [vmem:[#allocation11 + $0x48] sm:$0xff]  ;;  %v264_v3 = vld [vmem:[#allocation7 + $0x90] sm:$0xff]  ;;  %v1068_v4 = vpack.c.bf16 %v579_v60, %v577_v59  ;;  %v269_v10 = vld [vmem:[#allocation7 + $0xb8] sm:$0xff] }
  0x98   :  { %985 = vmatpush1.bf16.msra.mxu1 %v984_v63  ;;  %v1012_v63 = vpack.c.bf16 %v260_v45, %v258_v44  ;;  %v267_v6 = vld [vmem:[#allocation7 + $0xa8] sm:$0xff]  ;;  %v1070_v7 = vpack.c.bf16 %v584_v62, %v582_v61  ;;  %v588_v13 = vld [vmem:[#allocation11 + $0x78] sm:$0xff]  ;;  %v272_v28 = vld [vmem:[#allocation7 + $0xd0] sm:$0xff] }
  0x99   :  { %962 = vmatpush3.bf16.msra.mxu0 %v961_v58  ;;  %987 = vmatprep.subr.bf16.mxu1 %v986_v2  ;;  %v1066_v58 = vpack.c.bf16 %v580_v56, %v578_v55  ;;  %v262_v2 = vld [vmem:[#allocation7 + $0x80] sm:$0xff]  ;;  %v586_v11 = vld [vmem:[#allocation11 + $0x68] sm:$0xff]  ;;  %v591_v34 = vld [vmem:[#allocation11 + $0x90] sm:$0xff] }
  0x9a   :  { %963 = vmatprep.subr.bf16.mxu0 %v1385_v0  ;;  %v996_v0 = vpack.c.bf16 %v308_v18, %v306_v17  ;;  %v1016_v14 = vpack.c.bf16 %v264_v3, %v262_v2  ;;  %v1018_v18 = vpack.c.bf16 %v269_v10, %v267_v6  ;;  %v271_v19 = vld [vmem:[#allocation7 + $0xc8] sm:$0xff]  ;;  %v1074_v20 = vpack.c.bf16 %v588_v13, %v586_v11  ;;  %v277_v35 = vld [vmem:[#allocation7 + $0xf8] sm:$0xff]  ;;  %v276_v40 = vld [vmem:[#allocation7 + $0xf0] sm:$0xff] }
  0x9b   :  { %v594_v36 = vld [vmem:[#allocation11 + $0xa8] sm:$0xff]  ;;  %v596_v37 = vld [vmem:[#allocation11 + $0xb8] sm:$0xff]  ;;  %v593_v45 = vld [vmem:[#allocation11 + $0xa0] sm:$0xff] }
  0x9c   :  { %989 = vmatpush1.bf16.msra.mxu1 %v988_v8  ;;  %v581_v8 = vld [vmem:[#allocation11 + $0x40] sm:$0xff]  ;;  %v453_v43 = vld [vmem:[#allocation10 + $0x8] sm:$0xff]  ;;  %v1082_v44 = vpack.c.bf16 %v596_v37, %v594_v36  ;;  %v600_v49 = vld [vmem:[#allocation11 + $0xd8] sm:$0xff] }
  0x9d   :  { %965 = vmatpush3.bf16.msra.mxu0 %v964_v5  ;;  %991 = vmatprep.subr.bf16.mxu1 %v990_v9  ;;  %v1014_v5 = vpack.c.bf16 %v265_v48, %v263_v47  ;;  %v583_v9 = vld [vmem:[#allocation11 + $0x50] sm:$0xff]  ;;  %v455_v47 = vld [vmem:[#allocation10 + $0x18] sm:$0xff]  ;;  %v598_v48 = vld [vmem:[#allocation11 + $0xc8] sm:$0xff] }
  0x9e   :  { %1063 = vmatprep.subr.bf16.mxu0 %v1062_v53  ;;  %v1072_v17 = vpack.c.bf16 %v583_v9, %v581_v8  ;;  %v1086_v53 = vpack.c.bf16 %v600_v49, %v598_v48  ;;  %v597_v54 = vld [vmem:[#allocation11 + $0xc0] sm:$0xff]  ;;  %v599_v55 = vld [vmem:[#allocation11 + $0xd0] sm:$0xff]  ;;  %v602_v56 = vld [vmem:[#allocation11 + $0xe8] sm:$0xff] }
  0x9f   :  { %v601_v60 = vld [vmem:[#allocation11 + $0xe0] sm:$0xff]  ;;  %v603_v61 = vld [vmem:[#allocation11 + $0xf0] sm:$0xff]  ;;  %v606_v62 = vld [vmem:[#allocation11 + $0x108] sm:$0xff] }
  0xa0   :  { %940 = vmatmul.mubr.f32.vlgmr.msra.gmra.mrb[0].mxu0 %v1554_v12  ;;  %993 = vmatpush1.bf16.msra.mxu1 %v992_v15  ;;  %v246_v12 = vld [vmem:[#allocation7] sm:$0xff]  ;;  %v1092_v2 = vpack.c.bf16 %v603_v61, %v601_v60  ;;  %v610_v6 = vld [vmem:[#allocation11 + $0x128] sm:$0xff]  ;;  %v611_v11 = vld [vmem:[#allocation11 + $0x130] sm:$0xff] }
  0xa1   :  { %995 = vmatprep.subr.bf16.mxu1 %v994_v16  ;;  %v1000_v31 = vpack.c.bf16 %v248_v25, %v246_v12  ;;  %1065 = vmatpush1.bf16.msra.mxu0 %v1064_v57  ;;  %v266_v15 = vld [vmem:[#allocation7 + $0xa0] sm:$0xff]  ;;  %v268_v16 = vld [vmem:[#allocation7 + $0xb0] sm:$0xff]  ;;  %v590_v12 = vld [vmem:[#allocation11 + $0x88] sm:$0xff] }
  0xa2   :  { %1067 = vmatprep.subr.bf16.mxu0 %v1066_v58  ;;  %v592_v25 = vld [vmem:[#allocation11 + $0x98] sm:$0xff]  ;;  %v1088_v58 = vpack.c.bf16 %v599_v55, %v597_v54  ;;  %v609_v10 = vld [vmem:[#allocation11 + $0x120] sm:$0xff]  ;;  %v614_v13 = vld [vmem:[#allocation11 + $0x148] sm:$0xff] }
  0xa3   :  { %v604_v57 = vld [vmem:[#allocation11 + $0xf8] sm:$0xff]  ;;  %v627_v36 = vld [vmem:[#allocation11 + $0x1b0] sm:$0xff]  ;;  %v630_v37 = vld [vmem:[#allocation11 + $0x1c8] sm:$0xff] }
  0xa4   :  { %997 = vmatpush1.bf16.msra.mxu1 %v996_v0  ;;  %v585_v0 = vld [vmem:[#allocation11 + $0x60] sm:$0xff]  ;;  %v1090_v59 = vpack.c.bf16 %v604_v57, %v602_v56  ;;  %v462_v57 = vld [vmem:[#allocation10 + $0x50] sm:$0xff] }
  0xa5   :  { %999 = vmatprep.subr.bf16.mxu1 %v998_v21  ;;  %1069 = vmatpush1.bf16.msra.mxu0 %v1068_v4  ;;  %v587_v21 = vld [vmem:[#allocation11 + $0x70] sm:$0xff]  ;;  %v605_v4 = vld [vmem:[#allocation11 + $0x100] sm:$0xff] }
  0xa6   :  { %1071 = vmatprep.subr.bf16.mxu0 %v1070_v7  ;;  %v1076_v29 = vpack.c.bf16 %v587_v21, %v585_v0  ;;  %v612_v7 = vld [vmem:[#allocation11 + $0x138] sm:$0xff]  ;;  %v460_v56 = vld [vmem:[#allocation10 + $0x40] sm:$0xff] }
  0xa7   :  { %v1098_v9 = vpack.c.bf16 %v612_v7, %v610_v6  ;;  %v1040_v60 = vpack.c.bf16 %v462_v57, %v460_v56  ;;  %v468_v6 = vld [vmem:[#allocation10 + $0x80] sm:$0xff]  ;;  %v470_v7 = vld [vmem:[#allocation10 + $0x90] sm:$0xff] }
  0xa9   :  { %1073 = vmatpush1.bf16.msra.mxu0 %v1072_v17  ;;  %v613_v17 = vld [vmem:[#allocation11 + $0x140] sm:$0xff] }
  0xaa   :  { %1075 = vmatprep.subr.bf16.mxu0 %v1074_v20  ;;  %v620_v20 = vld [vmem:[#allocation11 + $0x178] sm:$0xff] }
  0xad   :  { %1077 = vmatpush1.bf16.msra.mxu0 %v1076_v29  ;;  %v621_v29 = vld [vmem:[#allocation11 + $0x180] sm:$0xff] }
 0x104   :  { %v222_v24 = vpop.permute.xlu0 %221 }
 0x105   :  { %vm223_vm1 = vcmp.eq.s32.totalorder %v1565_v23, %v222_v24  ;;  %v273_v24 = vld [vmem:[#allocation7 + $0xd8] sm:$0xff] }
 0x106   :  { %v850_v26 = vsel %vm223_vm1, 1.0, %v1387_v1 }
 0x10a   :  { %v228_v27 = vpop.permute.xlu0 %227 }
 0x10b   :  { %vm229_vm2 = vcmp.eq.s32.totalorder %v1565_v23, %v228_v27  ;;  %v270_v27 = vld [vmem:[#allocation7 + $0xc0] sm:$0xff] }
 0x10c   :  { %v851_v30 = vsel %vm229_vm2, 1.0, %v1387_v1 }
 0x10d   :  { %v232_v32 = vadd.f32 %v851_v30, %v850_v26  ;;  %v1020_v26 = vpack.c.bf16 %v268_v16, %v266_v15  ;;  %v1022_v30 = vpack.c.bf16 %v273_v24, %v271_v19  ;;  %v1100_v15 = vpack.c.bf16 %v611_v11, %v609_v10  ;;  %v618_v19 = vld [vmem:[#allocation11 + $0x168] sm:$0xff]  ;;  %v617_v24 = vld [vmem:[#allocation11 + $0x160] sm:$0xff] }
 0x10e   :  { %v1106_v21 = vpack.c.bf16 %v620_v20, %v618_v19  ;;  %v1048_v10 = vpack.c.bf16 %v470_v7, %v468_v6  ;;  %v476_v20 = vld [vmem:[#allocation10 + $0xc0] sm:$0xff]  ;;  %v744_v6 = vld [vmem:[#allocation13 + $0xb0] sm:$0xff]  ;;  %v745_v7 = vld [vmem:[#allocation13 + $0xb8] sm:$0xff] }
 0x10f   :  { %375 = vmatmul.mubr.f32.vlgmr.msra.gmra.mrb[0].mxu1 %v232_v32  ;;  %v1078_v32 = vpack.c.bf16 %v592_v25, %v590_v12  ;;  %v619_v12 = vld [vmem:[#allocation11 + $0x170] sm:$0xff]  ;;  %v622_v25 = vld [vmem:[#allocation11 + $0x188] sm:$0xff] }
 0x110   :  { %1001 = vmatpush1.bf16.msra.mxu1 %v1000_v31  ;;  %445 = vmatprep.mubr.f32.mxu1 %v1387_v1  ;;  %v275_v31 = vld [vmem:[#allocation7 + $0xe8] sm:$0xff] }
 0x111   :  { %1003 = vmatprep.subr.bf16.mxu1 %v1002_v33  ;;  %v589_v33 = vld [vmem:[#allocation11 + $0x80] sm:$0xff]  ;;  %v1026_v42 = vpack.c.bf16 %v277_v35, %v275_v31  ;;  %1079 = vmatprep.subr.bf16.mxu0 %v1078_v32  ;;  %v626_v31 = vld [vmem:[#allocation11 + $0x1a8] sm:$0xff]  ;;  %v628_v32 = vld [vmem:[#allocation11 + $0x1b8] sm:$0xff] }
 0x112   :  { %v1080_v41 = vpack.c.bf16 %v591_v34, %v589_v33  ;;  %v1114_v34 = vpack.c.bf16 %v628_v32, %v626_v31  ;;  %v625_v35 = vld [vmem:[#allocation11 + $0x1a0] sm:$0xff] }
 0x114   :  { %1005 = vmatpush1.bf16.msra.mxu1 %v1004_v38  ;;  %v1024_v38 = vpack.c.bf16 %v272_v28, %v270_v27  ;;  %1081 = vmatpush1.bf16.msra.mxu0 %v1080_v41  ;;  %v1108_v27 = vpack.c.bf16 %v619_v12, %v617_v24  ;;  %v452_v41 = vld [vmem:[#allocation10] sm:$0xff]  ;;  %v483_v24 = vld [vmem:[#allocation10 + $0xf8] sm:$0xff] }
 0x115   :  { %1007 = vmatprep.subr.bf16.mxu1 %v1006_v39  ;;  %v274_v39 = vld [vmem:[#allocation7 + $0xe0] sm:$0xff]  ;;  %1083 = vmatprep.subr.bf16.mxu0 %v1082_v44  ;;  %v459_v44 = vld [vmem:[#allocation10 + $0x38] sm:$0xff] }
 0x116   :  { %v1028_v50 = vpack.c.bf16 %v276_v40, %v274_v39  ;;  %v1116_v39 = vpack.c.bf16 %v627_v36, %v625_v35  ;;  %v634_v36 = vld [vmem:[#allocation11 + $0x1e8] sm:$0xff] }
 0x118   :  { %1009 = vmatpush1.bf16.msra.mxu1 %v1008_v46  ;;  %v595_v46 = vld [vmem:[#allocation11 + $0xb0] sm:$0xff] }
 0x119   :  { %1011 = vmatprep.subr.bf16.mxu1 %v1010_v52  ;;  %v1084_v51 = vpack.c.bf16 %v595_v46, %v593_v45  ;;  %v1030_v52 = vpack.c.bf16 %v455_v47, %v453_v43  ;;  %v457_v43 = vld [vmem:[#allocation10 + $0x28] sm:$0xff] }
 0x11a   :  { %v1034_v49 = vpack.c.bf16 %v459_v44, %v457_v43 }
 0x11b   :  { %1085 = vmatpush1.bf16.msra.mxu0 %v1084_v51  ;;  %v458_v51 = vld [vmem:[#allocation10 + $0x30] sm:$0xff] }
 0x11c   :  { %1013 = vmatpush1.bf16.msra.mxu1 %v1012_v63  ;;  %1087 = vmatprep.subr.bf16.mxu0 %v1086_v53  ;;  %v608_v63 = vld [vmem:[#allocation11 + $0x118] sm:$0xff] }
 0x11d   :  { %1015 = vmatprep.subr.bf16.mxu1 %v1014_v5  ;;  %v1094_v3 = vpack.c.bf16 %v608_v63, %v606_v62  ;;  %v607_v5 = vld [vmem:[#allocation11 + $0x110] sm:$0xff]  ;;  %v463_v53 = vld [vmem:[#allocation10 + $0x58] sm:$0xff]  ;;  %v464_v62 = vld [vmem:[#allocation10 + $0x60] sm:$0xff] }
 0x11e   :  { %v1096_v8 = vpack.c.bf16 %v607_v5, %v605_v4  ;;  %v466_v63 = vld [vmem:[#allocation10 + $0x70] sm:$0xff] }
 0x11f   :  { %1089 = vmatpush1.bf16.msra.mxu0 %v1088_v58  ;;  %v465_v58 = vld [vmem:[#allocation10 + $0x68] sm:$0xff]  ;;  %v1044_v4 = vpack.c.bf16 %v466_v63, %v464_v62  ;;  %v742_v62 = vld [vmem:[#allocation13 + $0xa0] sm:$0xff] }
 0x120   :  { %1017 = vmatpush1.bf16.msra.mxu1 %v1016_v14  ;;  %1091 = vmatprep.subr.bf16.mxu0 %v1090_v59  ;;  %v616_v14 = vld [vmem:[#allocation11 + $0x158] sm:$0xff]  ;;  %v743_v63 = vld [vmem:[#allocation13 + $0xa8] sm:$0xff] }
 0x121   :  { %1019 = vmatprep.subr.bf16.mxu1 %v1018_v18  ;;  %v1102_v16 = vpack.c.bf16 %v616_v14, %v614_v13  ;;  %v615_v18 = vld [vmem:[#allocation11 + $0x150] sm:$0xff]  ;;  %v467_v59 = vld [vmem:[#allocation10 + $0x78] sm:$0xff]  ;;  %v472_v13 = vld [vmem:[#allocation10 + $0xa0] sm:$0xff] }
 0x122   :  { %v1104_v0 = vpack.c.bf16 %v615_v18, %v613_v17  ;;  %v1042_v61 = vpack.c.bf16 %v467_v59, %v465_v58  ;;  %v474_v14 = vld [vmem:[#allocation10 + $0xb0] sm:$0xff]  ;;  %v479_v17 = vld [vmem:[#allocation10 + $0xd8] sm:$0xff] }
 0x123   :  { %1093 = vmatpush1.bf16.msra.mxu0 %v1092_v2  ;;  %v469_v2 = vld [vmem:[#allocation10 + $0x88] sm:$0xff]  ;;  %v1052_v18 = vpack.c.bf16 %v474_v14, %v472_v13  ;;  %v746_v13 = vld [vmem:[#allocation13 + $0xc0] sm:$0xff] }
 0x124   :  { %1021 = vmatpush1.bf16.msra.mxu1 %v1020_v26  ;;  %1095 = vmatprep.subr.bf16.mxu0 %v1094_v3  ;;  %v624_v26 = vld [vmem:[#allocation11 + $0x198] sm:$0xff]  ;;  %v747_v14 = vld [vmem:[#allocation13 + $0xc8] sm:$0xff] }
 0x125   :  { %1023 = vmatprep.subr.bf16.mxu1 %v1022_v30  ;;  %v1110_v28 = vpack.c.bf16 %v624_v26, %v622_v25  ;;  %v623_v30 = vld [vmem:[#allocation11 + $0x190] sm:$0xff]  ;;  %v471_v3 = vld [vmem:[#allocation10 + $0x98] sm:$0xff] }
 0x126   :  { %v1112_v33 = vpack.c.bf16 %v623_v30, %v621_v29  ;;  %v1046_v5 = vpack.c.bf16 %v471_v3, %v469_v2  ;;  %v1134_v3 = vpack.c.bf16 %v743_v63, %v742_v62 }
 0x127   :  { %1097 = vmatpush1.bf16.msra.mxu0 %v1096_v8  ;;  %v473_v8 = vld [vmem:[#allocation10 + $0xa8] sm:$0xff] }
 0x128   :  { %1025 = vmatpush1.bf16.msra.mxu1 %v1024_v38  ;;  %1099 = vmatprep.subr.bf16.mxu0 %v1098_v9  ;;  %v632_v38 = vld [vmem:[#allocation11 + $0x1d8] sm:$0xff] }
 0x129   :  { %1027 = vmatprep.subr.bf16.mxu1 %v1026_v42  ;;  %v1118_v40 = vpack.c.bf16 %v632_v38, %v630_v37  ;;  %v454_v42 = vld [vmem:[#allocation10 + $0x10] sm:$0xff]  ;;  %v475_v9 = vld [vmem:[#allocation10 + $0xb8] sm:$0xff] }
 0x12a   :  { %v1032_v46 = vpack.c.bf16 %v454_v42, %v452_v41  ;;  %v1050_v11 = vpack.c.bf16 %v475_v9, %v473_v8  ;;  %v636_v37 = vld [vmem:[#allocation11 + $0x1f8] sm:$0xff]  ;;  %v738_v41 = vld [vmem:[#allocation13 + $0x80] sm:$0xff]  ;;  %v739_v42 = vld [vmem:[#allocation13 + $0x88] sm:$0xff]  ;;  %v1138_v9 = vpack.c.bf16 %v745_v7, %v744_v6 }
 0x12b   :  { %1101 = vmatpush1.bf16.msra.mxu0 %v1100_v15  ;;  %v235_v15 = vpop.permute.xlu1 %234  ;;  %v1122_v38 = vpack.c.bf16 %v636_v37, %v634_v36  ;;  %v1126_v43 = vpack.c.bf16 %v739_v42, %v738_v41  ;;  %v737_v36 = vld [vmem:[#allocation13 + $0x78] sm:$0xff] }
 0x12c   :  { %1029 = vmatpush1.bf16.msra.mxu1 %v1028_v50  ;;  %1103 = vmatprep.subr.bf16.mxu0 %v1102_v16  ;;  %v456_v50 = vld [vmem:[#allocation10 + $0x20] sm:$0xff]  ;;  %v477_v16 = vld [vmem:[#allocation10 + $0xc8] sm:$0xff]  ;;  %vm236_vm3 = vcmp.eq.s32.totalorder %v1565_v23, %v235_v15 }
 0x12d   :  { %1031 = vmatprep.subr.bf16.mxu1 %v1030_v52  ;;  %v461_v52 = vld [vmem:[#allocation10 + $0x48] sm:$0xff]  ;;  %v1036_v54 = vpack.c.bf16 %v458_v51, %v456_v50  ;;  %v1054_v19 = vpack.c.bf16 %v479_v17, %v477_v16  ;;  %v852_v30 = vsel %vm236_vm3, 1.0, %v1387_v1  ;;  %v1142_v16 = vpack.c.bf16 %v747_v14, %v746_v13  ;;  %v730_v17 = vld [vmem:[#allocation13 + $0x40] sm:$0xff] }
 0x12e   :  { %v1038_v55 = vpack.c.bf16 %v463_v53, %v461_v52  ;;  %v722_v52 = vld [vmem:[#allocation13] sm:$0xff] }
 0x12f   :  { %1105 = vmatpush1.bf16.msra.mxu0 %v1104_v0  ;;  %v478_v0 = vld [vmem:[#allocation10 + $0xd0] sm:$0xff]  ;;  %v241_v12 = vpop.permute.xlu1 %240 }
 0x130   :  { %1107 = vmatprep.subr.bf16.mxu0 %v1106_v21  ;;  %v481_v21 = vld [vmem:[#allocation10 + $0xe8] sm:$0xff]  ;;  %v1056_v25 = vpack.c.bf16 %v478_v0, %v476_v20  ;;  %vm242_vm4 = vcmp.eq.s32.totalorder %v1565_v23, %v241_v12  ;;  %v749_v20 = vld [vmem:[#allocation13 + $0xd8] sm:$0xff] }
 0x131   :  { %v1058_v26 = vpack.c.bf16 %v483_v24, %v481_v21  ;;  %v853_v31 = vsel %vm242_vm4, 1.0, %v1387_v1  ;;  %v732_v24 = vld [vmem:[#allocation13 + $0x50] sm:$0xff]  ;;  %v733_v12 = vld [vmem:[#allocation13 + $0x58] sm:$0xff] }
 0x132   :  { %v245_v32 = vadd.f32 %v853_v31, %v852_v30  ;;  %v735_v30 = vld [vmem:[#allocation13 + $0x68] sm:$0xff] }
 0x133   :  { %1109 = vmatpush1.bf16.msra.mxu0 %v1108_v27  ;;  %v480_v27 = vld [vmem:[#allocation10 + $0xe0] sm:$0xff] }
 0x134   :  { %1111 = vmatprep.subr.bf16.mxu0 %v1110_v28  ;;  %v482_v28 = vld [vmem:[#allocation10 + $0xf0] sm:$0xff] }
 0x135   :  { %v1060_v29 = vpack.c.bf16 %v482_v28, %v480_v27  ;;  %v1148_v27 = vpack.c.bf16 %v733_v12, %v732_v24 }
 0x137   :  { %1113 = vmatpush1.bf16.msra.mxu0 %v1112_v33  ;;  %v629_v33 = vld [vmem:[#allocation11 + $0x1c0] sm:$0xff] }
 0x138   :  { %1115 = vmatprep.subr.bf16.mxu0 %v1114_v34  ;;  %v631_v34 = vld [vmem:[#allocation11 + $0x1d0] sm:$0xff] }
 0x139   :  { %v1120_v35 = vpack.c.bf16 %v631_v34, %v629_v33  ;;  %v753_v33 = vld [vmem:[#allocation13 + $0xf8] sm:$0xff] }
 0x13b   :  { %1117 = vmatpush1.bf16.msra.mxu0 %v1116_v39  ;;  %v633_v39 = vld [vmem:[#allocation11 + $0x1e0] sm:$0xff] }
 0x13c   :  { %1119 = vmatprep.subr.bf16.mxu0 %v1118_v40  ;;  %v635_v40 = vld [vmem:[#allocation11 + $0x1f0] sm:$0xff] }
 0x13d   :  { %v1124_v23 = vpack.c.bf16 %v635_v40, %v633_v39 }
 0x13f   :  { %1121 = vmatpush1.bf16.msra.mxu0 %v1120_v35  ;;  %v736_v35 = vld [vmem:[#allocation13 + $0x70] sm:$0xff] }
 0x140   :  { %1123 = vmatprep.subr.bf16.mxu0 %v1122_v38  ;;  %v1156_v37 = vpack.c.bf16 %v737_v36, %v736_v35  ;;  %v637_v38 = vld [vmem:[%s1618_s7] sm:$0x3]  ;;  %s1392_s7 = smov [#allocation14]  }
 0x141   :  { %s838_s22 = sshll.u32 %s1392_s7, 4  ;;  %s839_s22 = int_to_ptr.vmem [resolvable:$true] %s838_s22 }
 0x142   :  { %s1342_s25 = scalar_lea.vmem %s839_s22, 128  ;;  %p1347_p1 = scmp.lt.s32.totalorder %s839_s22, %s839_s22 }
 0x143   :  { %1125 = vmatpush1.bf16.msra.mxu0 %v1124_v23  ;;  %p1343_p0 = scmp.ne.s32.totalorder %s839_s22, %s1342_s25  ;;  %p1348_p2 = scmp.lt.s32.totalorder %s1342_s25, %s1342_s25 }
 0x144   :  { %1127 = vmatprep.subr.bf16.mxu0 %v1126_v43 }
 0x145   :  { %p1349_p3 = por %p1348_p2, %p1347_p1 }
 0x147   :  { %p1350_p4 = pnand %p1349_p3, %p1343_p0 }
 0x173   :  { %v212_v45 = vpop.f32.mrb[0].mxu0 }
 0x174   :  { %v216_v47 = vmax.f32 %v212_v45, 0.0  ;;  %v941_v48 = vpop.f32.mrb[1].mxu0  ;;  %v557_v45 = vld [vmem:[%s1614_s3] sm:$0x3] }
 0x176   :  { %446 = vmatmul.mubr.f32.vlgmr.msra.gmra.mrb[0].mxu1 %v216_v47 }
 0x177   :  { %1033 = vmatpush1.bf16.msra.mxu1 %v1032_v46  ;;  %548 = vmatprep.mubr.f32.mxu1 %v1387_v1  ;;  %v1578_v1 = vshrl.u32 %v217_v22, 7  ;;  %v723_v22 = vld [vmem:[#allocation13 + $0x8] sm:$0xff] }
 0x178   :  { %1035 = vmatprep.subr.bf16.mxu1 %v1034_v49  ;;  %v1128_v57 = vpack.c.bf16 %v723_v22, %v722_v52 }
 0x179   :  { %v561_v44 = vsub.s32 0, %v1578_v1  ;;  %v565_v46 = vsub.s32 1, %v1578_v1 }
 0x17b   :  { %1037 = vmatpush1.bf16.msra.mxu1 %v1036_v54  ;;  %v562_v47 = vrot.slane %v557_v45, %v561_v44  ;;  %v566_v48 = vrot.slane %v557_v45, %v565_v46  ;;  %v740_v54 = vld [vmem:[#allocation13 + $0x90] sm:$0xff]  ;;  %v642_v39 = vrot.slane %v637_v38, %v561_v44  ;;  %v646_v40 = vrot.slane %v637_v38, %v565_v46 }
 0x17c   :  { %1039 = vmatprep.subr.bf16.mxu1 %v1038_v55  ;;  %v741_v55 = vld [vmem:[#allocation13 + $0x98] sm:$0xff] }
 0x17d   :  { %v1130_v59 = vpack.c.bf16 %v741_v55, %v740_v54 }
 0x17f   :  { %1041 = vmatpush1.bf16.msra.mxu1 %v1040_v60  ;;  %v724_v60 = vld [vmem:[#allocation13 + $0x10] sm:$0xff] }
 0x180   :  { %1043 = vmatprep.subr.bf16.mxu1 %v1042_v61  ;;  %v725_v61 = vld [vmem:[#allocation13 + $0x18] sm:$0xff] }
 0x181   :  { %v1132_v2 = vpack.c.bf16 %v725_v61, %v724_v60 }
 0x183   :  { %1045 = vmatpush1.bf16.msra.mxu1 %v1044_v4  ;;  %v726_v4 = vld [vmem:[#allocation13 + $0x20] sm:$0xff] }
 0x184   :  { %1047 = vmatprep.subr.bf16.mxu1 %v1046_v5  ;;  %v727_v5 = vld [vmem:[#allocation13 + $0x28] sm:$0xff] }
 0x185   :  { %v1136_v8 = vpack.c.bf16 %v727_v5, %v726_v4 }
 0x187   :  { %1049 = vmatpush1.bf16.msra.mxu1 %v1048_v10  ;;  %v728_v10 = vld [vmem:[#allocation13 + $0x30] sm:$0xff] }
 0x188   :  { %1051 = vmatprep.subr.bf16.mxu1 %v1050_v11  ;;  %v729_v11 = vld [vmem:[#allocation13 + $0x38] sm:$0xff] }
 0x189   :  { %v1140_v15 = vpack.c.bf16 %v729_v11, %v728_v10 }
 0x18b   :  { %1053 = vmatpush1.bf16.msra.mxu1 %v1052_v18  ;;  %v731_v18 = vld [vmem:[#allocation13 + $0x48] sm:$0xff] }
 0x18c   :  { %1055 = vmatprep.subr.bf16.mxu1 %v1054_v19  ;;  %v748_v19 = vld [vmem:[#allocation13 + $0xd0] sm:$0xff]  ;;  %v1144_v0 = vpack.c.bf16 %v731_v18, %v730_v17 }
 0x18d   :  { %v1146_v21 = vpack.c.bf16 %v749_v20, %v748_v19 }
 0x18f   :  { %1057 = vmatpush1.bf16.msra.mxu1 %v1056_v25  ;;  %v750_v25 = vld [vmem:[#allocation13 + $0xe0] sm:$0xff] }
 0x190   :  { %1059 = vmatprep.subr.bf16.mxu1 %v1058_v26  ;;  %v751_v26 = vld [vmem:[#allocation13 + $0xe8] sm:$0xff] }
 0x191   :  { %v1150_v28 = vpack.c.bf16 %v751_v26, %v750_v25 }
 0x193   :  { %1061 = vmatpush1.bf16.msra.mxu1 %v1060_v29  ;;  %v734_v29 = vld [vmem:[#allocation13 + $0x60] sm:$0xff] }
 0x194   :  { %v1152_v31 = vpack.c.bf16 %v735_v30, %v734_v29 }
 0x196   :  { %549 = vmatmul.mubr.f32.vlgmr.msra.gmra.mrb[0].mxu1 %v245_v32  ;;  %v752_v32 = vld [vmem:[#allocation13 + $0xf0] sm:$0xff] }
 0x197   :  { %v1154_v34 = vpack.c.bf16 %v753_v33, %v752_v32 }
 0x269   :  { %v550_v49 = vpop.f32.mrb[0].mxu1 }
 0x26a   :  { %v569_v50 = vadd.f32 %v562_v47, %v550_v49  ;;  %v552_v51 = vpop.f32.mrb[1].mxu1  ;;  %v854_v49 = vld [vmem:[%s1620_s9] ss:$0 sm:$0xff] }
 0x26b   :  { %v570_v53 = vadd.f32 %v566_v48, %v552_v51 }
 0x26c   :  { %v571_v58 = vmax.f32 %v569_v50, 0.0 }
 0x26d   :  { %v572_v56 = vmax.f32 %v570_v53, 0.0 }
 0x26f   :  { %713 = vmatprep.mubr.f32.mxu0 %v572_v56 }
 0x270   :  { %714 = vmatmul.mubr.f32.vlgmr.msra.gmra.mrb[2].mxu0 %v571_v58 }
 0x271   :  { %1129 = vmatpush3.bf16.msra.mxu0 %v1128_v57 }
 0x272   :  { %1131 = vmatprep.subr.bf16.mxu0 %v1130_v59 }
 0x275   :  { %1133 = vmatpush3.bf16.msra.mxu0 %v1132_v2 }
 0x276   :  { %1135 = vmatprep.subr.bf16.mxu0 %v1134_v3 }
 0x279   :  { %1137 = vmatpush3.bf16.msra.mxu0 %v1136_v8 }
 0x27a   :  { %1139 = vmatprep.subr.bf16.mxu0 %v1138_v9 }
 0x27d   :  { %1141 = vmatpush3.bf16.msra.mxu0 %v1140_v15 }
 0x27e   :  { %1143 = vmatprep.subr.bf16.mxu0 %v1142_v16 }
 0x281   :  { %1145 = vmatpush3.bf16.msra.mxu0 %v1144_v0 }
 0x282   :  { %1147 = vmatprep.subr.bf16.mxu0 %v1146_v21 }
 0x285   :  { %1149 = vmatpush3.bf16.msra.mxu0 %v1148_v27 }
 0x286   :  { %1151 = vmatprep.subr.bf16.mxu0 %v1150_v28 }
 0x289   :  { %1153 = vmatpush3.bf16.msra.mxu0 %v1152_v31 }
 0x28a   :  { %1155 = vmatprep.subr.bf16.mxu0 %v1154_v34 }
 0x28d   :  { %1157 = vmatpush3.bf16.msra.mxu0 %v1156_v37 }
 0x343   :  { %v715_v23 = vpop.f32.mrb[2].mxu0 }
 0x344   :  { %v716_v41 = vadd.f32 %v715_v23, %v642_v39  ;;  %v717_v42 = vpop.f32.mrb[3].mxu0 }
 0x345   :  { %v718_v43 = vadd.f32 %v717_v42, %v646_v40 }
 0x346   :  { %v720_v47 = vmax.f32 %v716_v41, 0.0 }
 0x347   :  { %v721_v45 = vmax.f32 %v718_v43, 0.0 }
 0x349   :  { %825 = vmatprep.mubr.f32.mxu0 %v721_v45 }
 0x34a   :  { %826 = vmatmul.mubr.f32.vlgmr.msra.gmra.mrb[4].mxu0 %v720_v47 }
 0x41d   :  { %v904_v48 = vpop.f32.mrb[4].mxu0 }
 0x41e   :  { %v905_v50 = vpop.f32.mrb[5].mxu0 }
 0x41f   :  { %v906_v44 = vadd.f32 %v905_v50, %v904_v48 }
 0x421   :  { %v828_v51 = vadd.f32 %v906_v44, %v854_v49 }
 0x423   :  { %831 = vst [vmem:[#allocation14] sm:$0xff] %v828_v51 }
 0x424   :  { %1353 = shalt.err (!%p1350_p4)
}
 0x425   :  { %s1354_s6 = scalar_lea.hbm %s1621_s10, 128 }
 0x426   :  { %p1355_p5 = scmp.ne.s32.totalorder %s1621_s10, %s1354_s6  ;;  %p1358_p6 = scmp.lt.u32.totalorder %s1354_s6, %s1621_s10 }
 0x428   :  { %p1360_p7 = pnand %p1358_p6, %p1355_p5 }
 0x42a   :  { %1363 = shalt.err (!%p1360_p7)
}
 0x42b   :  { %841 = dma.vmem_to_hbm [thread:$0]  %s839_s22, 128, %s1621_s10, [#allocation4]  }
 0x42c   :  { %1372 = dma.done.wait [#allocation4], 128  }
 0x42d   :  { %1373 = vsyncadd [#allocation4], 4294967168 }
 0x42e   :  { %845 = vsyncpa [#allocation3], 1 }
 0x42f   :  { %846 = vsyncpa [#allocation6], 1 }
 0x430   :  { %847 = vsyncpa [#allocation9], 1 }
 0x431   :  { %848 = vsyncpa [#allocation12], 1 }
 0x432   :  { %849 = vsyncpa [#allocation4], 1 }

</bundles_post_ra>
